<compile_context>
chip_gen: v7x
topology: tpu7x:2x2x1
jax: 0.10.0
libtpu: 0.0.40
codegen_flags: <defaults>
</compile_context>

<pallas_src>
import functools

import jax
import jax.numpy as jnp
from jax.experimental import pallas as pl
from jax.experimental.pallas import tpu as pltpu

_MiB = 1024 * 1024


def _gate_kernel(x_ref, w_ref, b_ref, out_ref):
    # x arrives in its native dtype; cast to bf16 on the VPU (hidden under DMA).
    x_bf = x_ref[...].astype(jnp.bfloat16)
    logits = jnp.dot(x_bf, w_ref[...], preferred_element_type=jnp.float32)
    logits = logits + b_ref[...]                     # [1, E_pad] broadcast over [Tt, E_pad]
    # Per-row reductions: garbage rows from a ragged last tile (OOB reads) stay
    # isolated to their own row and are masked on store — do not "fix" this.
    m = jnp.max(logits, axis=-1, keepdims=True)
    e = jnp.exp(logits - m)
    denom = jnp.sum(e, axis=-1, keepdims=True)
    p = e / denom                                    # exact divide: free, kernel is DMA-bound
    # Drop padded experts (bias -1e30 -> exp exactly 0) in VMEM so the padded
    # [T, E_pad] scores never hit HBM and no post-kernel slice pass is needed.
    # TODO(synk): if downstream accepts bf16 combine weights, make out_ref bf16
    # to halve the writeback bytes.
    out_ref[...] = p[:, : out_ref.shape[-1]].astype(out_ref.dtype)


@functools.lru_cache(maxsize=1)
def _vmem_capacity_bytes():
    try:
        info = pltpu.get_tpu_info()
        cap = getattr(info, "vmem_capacity_bytes", None)
        if cap:
            return int(cap)
    except Exception:
        pass
    return 64 * _MiB  # conservative fallback = v7x per-TensorCore VMEM


def _pick_tile_t(T, H, E, E_pad, budget):
    """Largest token tile (multiple of 8, <= 2048) whose double-buffered x/out
    tiles + resident bf16 weight / f32 bias + in-kernel f32 temporaries fit
    `budget`; capped so there are >= 2 grid steps whenever T > 8 (both v7x
    TensorCores get work, free on 1-TC chips)."""
    if T <= 8:
        return T                                     # full-dim block is always legal
    per_row = 2 * H * 4 + 2 * E * 4 + 3 * E_pad * 4  # x/out double-buffers + f32 temps
    resident = H * E_pad * 2 + E_pad * 4             # bf16 weight + f32 bias row
    avail = max(budget - resident, per_row * 8)
    tile = min(avail // per_row, 2048)
    half = max((pl.cdiv(T, 2) // 8) * 8, 8)          # force grid >= 2
    tile = min(tile, half)
    return max((tile // 8) * 8, 8)


@functools.partial(jax.jit, static_argnames=("tot_expert",))
def gate_forward(x, w_bf, b_row, *, tot_expert):
    """x: [T, H] (f32 or bf16, native), w_bf: [H, E_pad] bf16 (zero-padded cols),
    b_row: [1, E_pad] f32 (-1e30 in padded cols) -> softmax scores [T, tot_expert] f32."""
    T, H = x.shape
    E_pad = w_bf.shape[1]
    E = tot_expert

    cap = _vmem_capacity_bytes()
    budget = 24 * _MiB if cap <= 64 * _MiB else 44 * _MiB
    tile_t = _pick_tile_t(T, H, E, E_pad, budget)
    grid = (pl.cdiv(T, tile_t),)

    x_bytes = jnp.dtype(x.dtype).itemsize
    # Derive the VMEM request from the actual working set (+ Mosaic headroom).
    working = (
        H * E_pad * 2 + E_pad * 4                    # resident weight + bias
        + 2 * tile_t * H * x_bytes                   # double-buffered x tiles
        + 2 * tile_t * E * 4                         # double-buffered out tiles
        + 3 * tile_t * E_pad * 4                     # f32 logits / exp temporaries
    )
    vmem_limit = max(int(working) + 6 * _MiB, 16 * _MiB)
    vmem_limit = int(min(vmem_limit, cap - 8 * _MiB))

    cost = pl.CostEstimate(
        flops=2 * T * H * E_pad,
        transcendentals=T * E_pad,
        bytes_accessed=T * H * x_bytes + H * E_pad * 2 + E_pad * 4 + T * E * 4,
    )

    return pl.pallas_call(
        _gate_kernel,
        out_shape=jax.ShapeDtypeStruct((T, E), jnp.float32),
        grid_spec=pl.GridSpec(
            grid=grid,
            in_specs=[
                pl.BlockSpec((tile_t, H), lambda i: (i, 0)),    # x: streamed per tile
                pl.BlockSpec((H, E_pad), lambda i: (0, 0)),     # w: VMEM-resident
                pl.BlockSpec((1, E_pad), lambda i: (0, 0)),     # b: VMEM-resident
            ],
            out_specs=pl.BlockSpec((tile_t, E), lambda i: (i, 0)),
        ),
        compiler_params=pltpu.CompilerParams(
            dimension_semantics=("parallel",),
            vmem_limit_bytes=vmem_limit,
        ),
        cost_estimate=cost,
    )(x, w_bf, b_row)


class BaseGate:
    """JAX/Pallas mirror of the PyTorch BaseGate (loss bookkeeping + gate kernel)."""

    def __init__(self, num_expert, world_size, d_model):
        self.world_size = world_size
        self.num_expert = num_expert
        self.tot_expert = world_size * num_expert
        self.loss = None
        # TODO(synk): the PyTorch BaseGate declares no parameters and forward()
        # is abstract; we materialize the canonical NaiveGate-style linear-gate
        # parameters implied by the gating contract.
        key = jax.random.PRNGKey(0)
        kw, _ = jax.random.split(key)
        self.weight = (
            jax.random.normal(kw, (d_model, self.tot_expert), dtype=jnp.float32) * 0.02
        )
        self.bias = jnp.zeros((self.tot_expert,), dtype=jnp.float32)

        # Pre-pad + pre-cast the gate parameters ONCE (hoisted out of forward):
        # lane-dense expert axis, zero weight columns and -1e30 bias in the pads
        # so padded experts contribute exactly 0 to the softmax denominator.
        E = self.tot_expert
        E_pad = max(((E + 127) // 128) * 128, 128)
        w_pad = jnp.pad(self.weight, ((0, 0), (0, E_pad - E))) if E_pad != E else self.weight
        b_pad = (
            jnp.pad(self.bias, (0, E_pad - E), constant_values=-1e30)
            if E_pad != E
            else self.bias
        )
        self.w_bf = w_pad.astype(jnp.bfloat16)
        self.b_row = b_pad.reshape(1, E_pad).astype(jnp.float32)

    def forward(self, x):
        # TODO(synk): BaseGate.forward raises NotImplementedError in PyTorch;
        # this is the canonical (NaiveGate-style) linear-gate hot path.
        return gate_forward(x, self.w_bf, self.b_row, tot_expert=self.tot_expert)

    def set_loss(self, loss):
        self.loss = loss

    def get_loss(self, clear=True):
        loss = self.loss
        if clear:
            self.loss = None
        return loss

    @property
    def has_loss(self):
        return self.loss is not None


if __name__ == "__main__":
    num_expert, world_size, d_model = 4, 2, 32
    tokens = 16  # e.g. batch=2 * seq=8 tokens, flattened

    gate = BaseGate(num_expert, world_size, d_model)

    key = jax.random.PRNGKey(0)
    x = jax.random.normal(key, (tokens, d_model), dtype=jnp.float32)

    scores = gate.forward(x)
    scores = jax.block_until_ready(scores)

    # Shape + softmax-normalization sanity (bf16 matmul => loose elementwise tol,
    # exact divide => tight row-sum).
    assert scores.shape == (tokens, world_size * num_expert)
    assert jnp.allclose(jnp.sum(scores, axis=-1), 1.0, atol=1e-3)

    # Validate against a pure-JAX f32 reference.
    ref = jax.nn.softmax(x @ gate.weight + gate.bias, axis=-1)
    assert jnp.allclose(scores, ref, atol=3e-2, rtol=3e-2)

    # Exercise loss bookkeeping (plain Python, mirrors PyTorch semantics).
    assert not gate.has_loss
    gate.set_loss(jnp.float32(0.5))
    assert gate.has_loss
    _ = gate.get_loss()
    assert not gate.has_loss

    print("KERNEL_OK")
</pallas_src>

<mosaic_0001>
module attributes {stable_mosaic.version = 11 : i64} {
  func.func @_gate_kernel(%arg0: i32, %arg1: memref<8x32xf32, #tpu.memory_space<vmem>>, %arg2: memref<32x128xbf16, #tpu.memory_space<vmem>>, %arg3: memref<1x128xf32, #tpu.memory_space<vmem>>, %arg4: memref<8x8xf32, #tpu.memory_space<vmem>>) attributes {dimension_semantics = [#tpu.dimension_semantics<parallel>], iteration_bounds = array<i64: 2>, scalar_prefetch = 0 : i64, scratch_operands = 0 : i64, tpu.core_type = #tpu.core_type<tc>, window_params = [{transform_indices = @transform_0, window_bounds = array<i64: 8, 32>}, {pipeline_mode = #tpu.pipeline_mode<synchronous>, transform_indices = @transform_1, window_bounds = array<i64: 32, 128>}, {pipeline_mode = #tpu.pipeline_mode<synchronous>, transform_indices = @transform_2, window_bounds = array<i64: 1, 128>}, {transform_indices = @transform_3, window_bounds = array<i64: 8, 8>}]} {
    %c0 = arith.constant 0 : index
    %c0_0 = arith.constant 0 : index
    %0 = vector.load %arg1[%c0, %c0_0] : memref<8x32xf32, #tpu.memory_space<vmem>>, vector<8x32xf32>
    %1 = arith.truncf %0 : vector<8x32xf32> to vector<8x32xbf16>
    %c0_1 = arith.constant 0 : index
    %c0_2 = arith.constant 0 : index
    %2 = vector.load %arg2[%c0_1, %c0_2] : memref<32x128xbf16, #tpu.memory_space<vmem>>, vector<32x128xbf16>
    %cst = arith.constant dense<0.000000e+00> : vector<8x128xf32>
    %3 = tpu.matmul %1, %2, %cst {dimension_numbers = #tpu.dot_dimension_numbers<[1], [0], [0], [1], [0, 0, 1, 1], [], []>} : vector<8x32xbf16>, vector<32x128xbf16>, vector<8x128xf32> -> vector<8x128xf32>
    %c0_3 = arith.constant 0 : index
    %c0_4 = arith.constant 0 : index
    %4 = vector.load %arg3[%c0_3, %c0_4] : memref<1x128xf32, #tpu.memory_space<vmem>>, vector<1x128xf32>
    %5 = vector.broadcast %4 : vector<1x128xf32> to vector<8x128xf32>
    %6 = arith.addf %3, %5 : vector<8x128xf32>
    %cst_5 = arith.constant dense<0xFF800000> : vector<8xf32>
    %7 = vector.multi_reduction <maximumf>, %6, %cst_5 [1] : vector<8x128xf32> to vector<8xf32>
    %8 = vector.shape_cast %7 : vector<8xf32> to vector<8x1xf32>
    %9 = vector.broadcast %8 : vector<8x1xf32> to vector<8x128xf32>
    %10 = arith.subf %6, %9 : vector<8x128xf32>
    %11 = math.exp %10 : vector<8x128xf32>
    %cst_6 = arith.constant dense<0.000000e+00> : vector<8xf32>
    %12 = vector.multi_reduction <add>, %11, %cst_6 [1] : vector<8x128xf32> to vector<8xf32>
    %13 = vector.shape_cast %12 : vector<8xf32> to vector<8x1xf32>
    %14 = vector.broadcast %13 : vector<8x1xf32> to vector<8x128xf32>
    %15 = arith.divf %11, %14 : vector<8x128xf32>
    %16 = vector.extract_strided_slice %15 {offsets = [0, 0], sizes = [8, 8], strides = [1, 1]} : vector<8x128xf32> to vector<8x8xf32>
    %c0_7 = arith.constant 0 : index
    %c0_8 = arith.constant 0 : index
    %17 = vector.load %arg4[%c0_7, %c0_8] : memref<8x8xf32, #tpu.memory_space<vmem>>, vector<8x8xf32>
    tpu.vector_store %arg4[%c0_7, %c0_8], %16 {strides = array<i32>} : memref<8x8xf32, #tpu.memory_space<vmem>>, vector<8x8xf32>,
    return
  }
  func.func @transform_0(%arg0: i32) -> (i32, i32) {
    %c0_i32 = arith.constant 0 : i32
    %c0_i32_0 = arith.constant 0 : i32
    return %arg0, %c0_i32 : i32, i32
  }
  func.func @transform_1(%arg0: i32) -> (i32, i32) {
    %c0_i32 = arith.constant 0 : i32
    %c0_i32_0 = arith.constant 0 : i32
    %c0_i32_1 = arith.constant 0 : i32
    return %c0_i32, %c0_i32_0 : i32, i32
  }
  func.func @transform_2(%arg0: i32) -> (i32, i32) {
    %c0_i32 = arith.constant 0 : i32
    %c0_i32_0 = arith.constant 0 : i32
    %c0_i32_1 = arith.constant 0 : i32
    return %c0_i32, %c0_i32_0 : i32, i32
  }
  func.func @transform_3(%arg0: i32) -> (i32, i32) {
    %c0_i32 = arith.constant 0 : i32
    %c0_i32_0 = arith.constant 0 : i32
    return %arg0, %c0_i32 : i32, i32
  }
}

</mosaic_0001>

<bundles_post_ra>
// kernel: gate_forward.1
= control target key start
LH: loop header
LB: loop body
LE: loop exit
PB: predicated region body
PF: predicated region fallthrough
CT: control target
= control target key end

     0   :  { %8 = vsyncpa [#allocation3], 0  ;;  %s710_s0 = inlined_call_operand.hbm [shape: f32[16,32], index: 0, kind: input, shape index: {}]   ;;  %s711_s1 = inlined_call_operand.hbm [shape: bf16[32,128], index: 1, kind: input, shape index: {}]   ;;  %s712_s2 = inlined_call_operand.vmem [shape: f32[1,128], index: 2, kind: input, shape index: {}]   ;;  %s713_s3 = inlined_call_operand.vmem [shape: f32[16,8], index: 3, kind: output, shape index: {}]  }
   0x1   :  { %10 = vsyncpa [#allocation3 + $0x1], 0 }
   0x2   :  { %11 = vsyncpa [#allocation5], 0  ;;  %s568_s12 = smov 0   ;;  %s570_s13 = smov 0  }
   0x3   :  { %s572_s14 = smov 0   ;;  %s574_s15 = smov 0  }
   0x4 LB: > { %s587_s16 = sadd.s32 4294967295, %s540_s15   ;;  %p37_p0 = scmp.ne.s32.totalorder %s532_s13, %s528_s12  ;;  %s540_s15 = sphi %s574_s15, %s728_s15   ;;  %s536_s14 = sphi %s572_s14, %s727_s14   ;;  %s532_s13 = sphi %s570_s13, %s726_s13   ;;  %s528_s12 = sphi %s568_s12, %s725_s12  }
   0x5   : > { %p714_p1 = scmp.eq.s32.totalorder %s587_s16, 0  ;;  %p358_p2 = scmp.ge.s32.totalorder %s540_s15, 1 }
   0x6   : > { %p116_p3 = scmp.lt.s32.totalorder %s540_s15, 3  ;;  %s542_s19 = smov [#allocation4]  }
   0x7   : > { %p595_p4 = por %p714_p1, %p37_p0  ;;  %s128_s20 = sshll.u32 %s542_s19, 4  ;;  %s129_s20 = int_to_ptr.vmem [resolvable:$true] %s128_s20 }
   0x8   : > { %p599_p5 = pnand %p358_p2, %p116_p3  ;;  %s612_s22 = sadd.s32 1, %s540_s15  }
   0x9   : > { %s717_s17 = scalar_select %p595_p4, 1, 0 }
   0xa   : > { %s718_s18 = scalar_select %p599_p5, 1, 0 }
   0xb   : > { %p390_p6 = pneg %p599_p5  ;;  %s24_s23 = sadd.s32 1, %s536_s14 }
   0xc   : > { %s21_s24 = ssub.s32 %s540_s15, %s612_s22  ;;  %s444_s27 = scalar_lea.hbm %s711_s1, 256 }
   0xd   : > { %p607_p7 = pnand %p390_p6, %p714_p1  ;;  %p445_p8 = scmp.ne.s32.totalorder %s711_s1, %s444_s27 }
   0xe   : > { %p451_p12 = scmp.lt.u32.totalorder %s444_s27, %s711_s1 }
   0xf   : > { %p446_p9 = pneg %p607_p7 }
  0x11   : > { %p447_p10 = pnand %p446_p9, %p445_p8 }
  0x13   : > { %p448_p11 = pneg %p447_p10 }
  0x15   : > { %p453_p13 = pnand %p451_p12, %p448_p11 }
  0x17   : > { %456 = shalt.err (!%p453_p13)
}
  0x18   : > { %s457_s5 = scalar_lea.vmem %s129_s20, 256  ;;  %p465_p6 = scmp.lt.s32.totalorder %s129_s20, %s129_s20 }
  0x19   : > { %p458_p0 = scmp.ne.s32.totalorder %s129_s20, %s457_s5  ;;  %p466_p1 = scmp.lt.s32.totalorder %s457_s5, %s457_s5 }
  0x1b   : > { %p460_p2 = pnand %p458_p0, %p446_p9  ;;  %p467_p4 = por %p466_p1, %p465_p6 }
  0x1d   : > { %p461_p3 = pneg %p460_p2 }
  0x1f   : > { %p468_p5 = pnand %p467_p4, %p461_p3 }
  0x21   : > { %471 = shalt.err (!%p468_p5)
}
  0x22   : > { %s543_s6 = smov 64   ;;  %s544_s7 = smov 4  }
  0x23   : > { %393 = dma.hbm_to_vmem [thread:$0]  (!%p607_p7), %s711_s1, 256, %s129_s20, [#allocation5], %s543_s6, %s543_s6, %s544_s7  }
  0x24   : > { %p22_p8 = scmp.eq.s32.totalorder %s21_s24, 0  ;;  %p31_p9 = scmp.ne.s32.totalorder %s536_s14, %s532_s13 }
  0x25   : > { %p32_p1 = scmp.eq.s32.totalorder %s540_s15, 0  ;;  %p399_p4 = scmp.lt.s32.totalorder %s540_s15, 2 }
  0x26   : > { %s638_s10 = scalar_select %p22_p8, %s536_s14, %s24_s23  }
  0x27   : > { %p33_p5 = por %p32_p1, %p31_p9  ;;  %s145_s11 = sand.u32 1, %s536_s14  }
  0x28   : > { %s361_s12 = sshll.u32 %s145_s11, 3  ;;  %s362_s19 = sshll.u32 %s540_s15, 7 }
  0x29   : > { %s645_s27 = scalar_lea.hbm %s710_s0, %s362_s19  ;;  %s149_s20 = scalar_lea.vmem [#allocation2], %s361_s12 }
  0x2a   : > { %s156_s21 = sshll.u32 %s149_s20, 4  ;;  %p649_p7 = pnand %p399_p4, %p33_p5  ;;  %s647_s21 = int_to_ptr.vmem [resolvable:$true] %s156_s21 }
  0x2b   : > { %s146_s15 = scalar_lea.sflag [#allocation3], %s145_s11  ;;  %s472_s24 = scalar_lea.hbm %s645_s27, 128 }
  0x2c   : > { %p473_p10 = scmp.ne.s32.totalorder %s645_s27, %s472_s24  ;;  %p474_p11 = pneg %p649_p7 }
  0x2d   : > { %s477_s30 = scalar_lea.hbm %s710_s0, 256  ;;  %p478_p0 = scmp.lt.u32.totalorder %s645_s27, %s710_s0 }
  0x2e   : > { %p475_p12 = pnand %p474_p11, %p473_p10  ;;  %p479_p2 = scmp.lt.u32.totalorder %s477_s30, %s472_s24 }
  0x2f   : > { %p481_p6 = scmp.lt.u32.totalorder %s472_s24, %s645_s27 }
  0x30   : > { %p476_p13 = pneg %p475_p12  ;;  %p480_p3 = por %p479_p2, %p478_p0 }
  0x32   : > { %p482_p8 = por %p481_p6, %p480_p3 }
  0x34   : > { %p483_p9 = pnand %p482_p8, %p476_p13 }
  0x36   : > { %486 = shalt.err (!%p483_p9)
}
  0x37   : > { %s487_s6 = scalar_lea.vmem %s647_s21, 128  ;;  %s545_s7 = smov [#allocation2]  }
  0x38   : > { %p488_p1 = scmp.ne.s32.totalorder %s647_s21, %s487_s6  ;;  %s492_s8 = sshll.u32 %s545_s7, 4  ;;  %s493_s8 = int_to_ptr.vmem [resolvable:$false] %s492_s8 }
  0x39   : > { %s494_s9 = scalar_lea.vmem %s493_s8, 256  ;;  %p495_p10 = scmp.lt.s32.totalorder %s647_s21, %s493_s8 }
  0x3a   : > { %p490_p4 = pnand %p488_p1, %p474_p11  ;;  %p496_p12 = scmp.lt.s32.totalorder %s494_s9, %s487_s6 }
  0x3c   : > { %p491_p5 = pneg %p490_p4  ;;  %p497_p0 = por %p496_p12, %p495_p10 }
  0x3e   : > { %p498_p2 = pnand %p497_p0, %p491_p5 }
  0x40   : > { %501 = shalt.err (!%p498_p2)
}
  0x41   : > { %397 = dma.hbm_to_vmem [thread:$0]  (!%p649_p7), %s645_s27, 128, %s647_s21, %s146_s15  }
  0x42   : > { %p721_p13 = scmp.ne.s32.totalorder %s718_s18, 0 }
  0x43   : > { %s167_s11 = sand.u32 (!%p721_p13), 1, %s532_s13   ;;  %p722_p11 = scmp.ne.s32.totalorder (!%p721_p13), %s717_s17, 0 }
  0x44   : > { %165 = sbr.rel (%p721_p13) target bundleno = 615 (0x267), region = 32  ;;  %s364_s12 = sshll.u32 (!%p721_p13), %s167_s11, 3 }
  0x45   : > { %s168_s19 = scalar_lea.sflag (!%p721_p13), [#allocation3], %s167_s11  ;;  %s171_s25 = scalar_lea.vmem (!%p721_p13), [#allocation2], %s364_s12 }
  0x4b   : > { %519 = dma.done.wait (%p722_p11), %s168_s19, 128  }
  0x4c   : > { %521 = vsyncadd (%p722_p11), %s168_s19, 4294967168  ;;  %p723_p3 = scmp.eq.s32.totalorder %s587_s16, 0 }
  0x4e   : > { %523 = dma.done.wait (%p723_p3), [#allocation5], 256   ;;  %p724_p6 = pmov %p723_p3 }
  0x4f   : > { %v546_v0 = vmov 0.0   ;;  %vm547_vm0 = vmmov 0   ;;  %v438_v1 = vld [vmem:[#allocation4] sm:$0xff]   ;;  %v439_v2 = vld [vmem:[#allocation4 + $0x8] sm:$0xff]   ;;  %v202_v3 = vld [vmem:[%s171_s25] sm:$0xff]  ;;  %vm227_vm1 = vcmask 261120  }
  0x50   : > { %525 = vsyncadd (%p724_p6), [#allocation5], 4294967040  ;;  %376 = vmatprep.subr.bf16.mxu0 %v546_v0  ;;  %380 = vmatprep.mubr.msk.bf16.mxu0 %vm547_vm0, %v546_v0  ;;  %v203_v4 = vpack.c.bf16 %v202_v3, %v202_v3  ;;  %v367_v5 = vld [vmem:[%s712_s2] ss:$0 sm:$0xff]  ;;  %p197_p7 = scmp.lt.s32.totalorder %s587_s16, 1  ;;  %vm280_vm2 = vcmask 64512  }
  0x51   : > { %377 = vmatpush3.bf16.msra.mxu0 %v438_v1 }
  0x52   : > { %378 = vmatprep.subr.bf16.mxu0 %v546_v0  ;;  %s730_s16 = smov (!%p197_p7, %s587_s16), 1 }
  0x53   : > { %s366_s26 = sshll.u32 %s730_s16, 3 }
  0x54   : > { %s200_s21 = scalar_lea.vmem %s713_s3, %s366_s26 }
  0x55   : > { %379 = vmatpush3.bf16.msra.mxu0 %v439_v2 }
  0x58   : > { %381 = vmatmul.mubr.msk.bf16.vlgmr.msra.gmra.mrb[0].mxu0 %vm227_vm1, %v203_v4 }
 0x12b   : > { %v265_v6 = vpop.f32.mrb[0].mxu0 }
 0x12c   : > { %v266_v7 = vadd.f32 %v367_v5, %v265_v6  ;;  %v382_v8 = vpop.f32.mrb[1].mxu0 }
 0x12d   : > { %v268_v9 = vpop.f32.mrb[2].mxu0 }
 0x12e   : > { %271 = vmax.xlane.f32.xlu0 %v266_v7  ;;  %v383_v10 = vpop.f32.mrb[3].mxu0 }
 0x1bb   : > { %v272_v11 = vpop.xlane.xlu0 %271 }
 0x1bc   : > { %v273_v12 = vsub.f32 %v266_v7, %v272_v11 }
 0x1be   : > { %v274_v13 = vmul.f32 1.442695, %v273_v12 }
 0x1c0   : > { %440 = vpow2.f32 %v274_v13 }
 0x1ca   : > { %v441_v14 = vpop.eup %440 }
 0x1cb   : > { %276 = vadd.xlane.f32.xlu0 %v441_v14 }
 0x258   : > { %v277_v15 = vpop.xlane.xlu0 %276 }
 0x259   : > { %442 = vrcp.f32 %v277_v15 }
 0x263   : > { %v443_v16 = vpop.eup %442 }
 0x264   : > { %v279_v17 = vmul.f32 %v443_v16, %v441_v14 }
 0x266   : > { %281 = vst.msk [vmem:[%s200_s21] sm:$0xff] %vm280_vm2, %v279_v17 }
 0x267 PF: > { %p14_p8 = scmp.ge.s32.totalorder %s612_s22, 4   ;;  %s725_s12 = smov %s532_s13 }
 0x268   : > { %s726_s13 = smov %s536_s14  ;;  %s727_s14 = smov %s638_s10 }
 0x269   : > { %s728_s15 = smov %s612_s22  ;;  %16 = sbr.rel (!%p14_p8) target bundleno = 4 (0x4), region = 76 }
 0x270   :  { %301 = vsyncpa [#allocation3], 1 }
 0x271   :  { %303 = vsyncpa [#allocation3 + $0x1], 1 }
 0x272   :  { %304 = vsyncpa [#allocation5], 1 }

</bundles_post_ra>
